<compile_context>
chip_gen: v5e
topology: v5e:2x2
jax: 0.10.0
libtpu: 0.0.40
codegen_flags: <defaults>
</compile_context>

<pallas_src>
import jax
import jax.numpy as jnp
from jax.experimental import pallas as pl
from jax.experimental.pallas import tpu as pltpu


def _downsample_gemm_kernel(cols_ref, w_ref, b_ref, o_ref):
    # cols_ref: (1, 9*C, M)  im2col patches for TD depth slices of one batch (lane dim = M)
    # w_ref   : (Co, 9*C)    conv weights reshaped to a single 2D lane-dense slab
    # b_ref   : (Co, 1)      bias column
    # o_ref   : (1, Co, M)   lane-dense output block (maps straight onto NCDHW)
    acc = jnp.dot(w_ref[...], cols_ref[0], preferred_element_type=jnp.float32)
    acc = acc + b_ref[...].astype(jnp.float32)   # f32 elementwise (cheap on v5e too)
    o_ref[0] = acc.astype(o_ref.dtype)


def _choose_depth_tile(D, Ho, Wo, C, Co, elem_bytes, budget_bytes=12 * 1024 * 1024):
    """Largest TD dividing D whose double-buffered blocks fit the VMEM budget and
    keep the lane dim legal (full extent or a multiple of 128)."""
    best = None
    for td in range(1, D + 1):
        if D % td != 0:
            continue
        m = td * Ho * Wo
        if td != D and m % 128 != 0:
            continue
        if 2 * (9 * C + Co) * m * elem_bytes <= budget_bytes:
            best = td
    if best is None:
        best = 1  # TODO(synk): no aligned depth tile fits the VMEM budget; fall back (may be slow)
    return best


def downsample(x, weight, bias):
    """Forward of nn.Conv3d(dim, dim, (1,3,3), stride=(1,2,2), padding=(0,1,1)).

    x: (N, C, D, H, W); weight: (Co, Ci, 1, 3, 3); bias: (Co,).
    Returns (N, Co, D, Ho, Wo) (NCDHW), matching torch.
    """
    N, C, D, H, W = x.shape
    Co = weight.shape[0]
    Ho = (H + 2 - 3) // 2 + 1
    Wo = (W + 2 - 3) // 2 + 1

    # --- wrapper-side layout plumbing (single XLA im2col fusion) ---
    xpad = jnp.pad(x, ((0, 0), (0, 0), (0, 0), (1, 1), (1, 1)))    # (N, C, D, H+2, W+2)
    taps = [
        xpad[:, :, :, kh:kh + 2 * Ho:2, kw:kw + 2 * Wo:2]          # (N, C, D, Ho, Wo)
        for kh in range(3) for kw in range(3)
    ]
    cols = jnp.stack(taps, axis=1).reshape(N, 9 * C, D * Ho * Wo)  # (N, 9C, D*Ho*Wo)

    # weight -> (Co, 9C) with K index = (kh*3 + kw)*C + c, matching `cols`
    w2 = jnp.transpose(weight[:, :, 0, :, :], (0, 2, 3, 1)).reshape(Co, 9 * C)
    b2 = bias.reshape(Co, 1)

    elem_bytes = jnp.dtype(x.dtype).itemsize
    TD = _choose_depth_tile(D, Ho, Wo, C, Co, elem_bytes)
    M = TD * Ho * Wo
    grid = (N, D // TD)

    out = pl.pallas_call(
        _downsample_gemm_kernel,
        out_shape=jax.ShapeDtypeStruct((N, Co, D * Ho * Wo), x.dtype),
        grid=grid,
        in_specs=[
            pl.BlockSpec((1, 9 * C, M), lambda n, d: (n, 0, d)),
            pl.BlockSpec((Co, 9 * C), lambda n, d: (0, 0)),
            pl.BlockSpec((Co, 1), lambda n, d: (0, 0)),
        ],
        out_specs=pl.BlockSpec((1, Co, M), lambda n, d: (n, 0, d)),
        compiler_params=pltpu.CompilerParams(
            dimension_semantics=("parallel", "parallel"),
        ),
    )(cols, w2, b2)

    # Free reshape (no transpose): lane-flattened spatial axis back to (D, Ho, Wo),
    # already in NCDHW order.
    return out.reshape(N, Co, D, Ho, Wo)


if __name__ == "__main__":
    key = jax.random.PRNGKey(0)
    kx, kw, kb = jax.random.split(key, 3)

    # small shapes consistent with the module: dim (=C) = 4, depth D = 3, spatial 16x16
    N, dim, D, H, W = 2, 4, 3, 16, 16
    x = jax.random.normal(kx, (N, dim, D, H, W), dtype=jnp.float32)
    weight = 0.1 * jax.random.normal(kw, (dim, dim, 1, 3, 3), dtype=jnp.float32)
    bias = 0.1 * jax.random.normal(kb, (dim,), dtype=jnp.float32)

    out = jax.block_until_ready(downsample(x, weight, bias))

    # reference check against XLA's conv (same semantics as torch Conv3d forward)
    ref = jax.lax.conv_general_dilated(
        x, weight,
        window_strides=(1, 2, 2),
        padding=((0, 0), (1, 1), (1, 1)),
        dimension_numbers=("NCDHW", "OIDHW", "NCDHW"),
    ) + bias.reshape(1, dim, 1, 1, 1)

    assert out.shape == (N, dim, D, H // 2, W // 2), out.shape
    assert jnp.allclose(out, ref, atol=1e-4, rtol=1e-4)

    print("KERNEL_OK")
</pallas_src>

<mosaic_0001>
module attributes {stable_mosaic.version = 11 : i64} {
  func.func @_downsample_gemm_kernel(%arg0: i32, %arg1: i32, %arg2: memref<1x36x192xf32, #tpu.memory_space<vmem>>, %arg3: memref<4x36xf32, #tpu.memory_space<vmem>>, %arg4: memref<4x1xf32, #tpu.memory_space<vmem>>, %arg5: memref<1x4x192xf32, #tpu.memory_space<vmem>>) attributes {dimension_semantics = [#tpu.dimension_semantics<parallel>, #tpu.dimension_semantics<parallel>], iteration_bounds = array<i64: 2, 1>, scalar_prefetch = 0 : i64, scratch_operands = 0 : i64, tpu.core_type = #tpu.core_type<tc>, window_params = [{transform_indices = @transform_0, window_bounds = array<i64: 1, 36, 192>}, {pipeline_mode = #tpu.pipeline_mode<synchronous>, transform_indices = @transform_1, window_bounds = array<i64: 4, 36>}, {pipeline_mode = #tpu.pipeline_mode<synchronous>, transform_indices = @transform_2, window_bounds = array<i64: 4, 1>}, {transform_indices = @transform_3, window_bounds = array<i64: 1, 4, 192>}]} {
    %c0 = arith.constant 0 : index
    %c0_0 = arith.constant 0 : index
    %0 = vector.load %arg3[%c0, %c0_0] : memref<4x36xf32, #tpu.memory_space<vmem>>, vector<4x36xf32>
    %c0_1 = arith.constant 0 : index
    %c0_2 = arith.constant 0 : index
    %c0_3 = arith.constant 0 : index
    %1 = vector.load %arg2[%c0_1, %c0_2, %c0_3] : memref<1x36x192xf32, #tpu.memory_space<vmem>>, vector<1x36x192xf32>
    %2 = vector.shape_cast %1 : vector<1x36x192xf32> to vector<36x192xf32>
    %cst = arith.constant dense<0.000000e+00> : vector<4x192xf32>
    %3 = tpu.matmul %0, %2, %cst {dimension_numbers = #tpu.dot_dimension_numbers<[1], [0], [0], [1], [0, 0, 1, 1], [], []>} : vector<4x36xf32>, vector<36x192xf32>, vector<4x192xf32> -> vector<4x192xf32>
    %c0_4 = arith.constant 0 : index
    %c0_5 = arith.constant 0 : index
    %4 = vector.load %arg4[%c0_4, %c0_5] : memref<4x1xf32, #tpu.memory_space<vmem>>, vector<4x1xf32>
    %5 = vector.broadcast %4 : vector<4x1xf32> to vector<4x192xf32>
    %6 = arith.addf %3, %5 : vector<4x192xf32>
    %c0_6 = arith.constant 0 : index
    %c0_7 = arith.constant 0 : index
    %c0_8 = arith.constant 0 : index
    %7 = vector.load %arg5[%c0_6, %c0_7, %c0_8] : memref<1x4x192xf32, #tpu.memory_space<vmem>>, vector<1x4x192xf32>
    %8 = vector.shape_cast %7 : vector<1x4x192xf32> to vector<4x192xf32>
    %9 = vector.shape_cast %6 : vector<4x192xf32> to vector<1x4x192xf32>
    tpu.vector_store %arg5[%c0_6, %c0_7, %c0_8], %9 {strides = array<i32>} : memref<1x4x192xf32, #tpu.memory_space<vmem>>, vector<1x4x192xf32>,
    return
  }
  func.func @transform_0(%arg0: i32, %arg1: i32) -> (i32, i32, i32) {
    %c0_i32 = arith.constant 0 : i32
    %c0_i32_0 = arith.constant 0 : i32
    return %arg0, %c0_i32, %arg1 : i32, i32, i32
  }
  func.func @transform_1(%arg0: i32, %arg1: i32) -> (i32, i32) {
    %c0_i32 = arith.constant 0 : i32
    %c0_i32_0 = arith.constant 0 : i32
    %c0_i32_1 = arith.constant 0 : i32
    return %c0_i32, %c0_i32_0 : i32, i32
  }
  func.func @transform_2(%arg0: i32, %arg1: i32) -> (i32, i32) {
    %c0_i32 = arith.constant 0 : i32
    %c0_i32_0 = arith.constant 0 : i32
    %c0_i32_1 = arith.constant 0 : i32
    return %c0_i32, %c0_i32_0 : i32, i32
  }
  func.func @transform_3(%arg0: i32, %arg1: i32) -> (i32, i32, i32) {
    %c0_i32 = arith.constant 0 : i32
    %c0_i32_0 = arith.constant 0 : i32
    return %arg0, %c0_i32, %arg1 : i32, i32, i32
  }
}

</mosaic_0001>

<bundles_post_ra>
// kernel: tpu_custom_call.1
= control target key start
LH: loop header
LB: loop body
LE: loop exit
PB: predicated region body
PF: predicated region fallthrough
CT: control target
= control target key end

     0   :  { %8 = vsyncpa [#allocation3], 0  ;;  %s654_s0 = inlined_call_operand.vmem [shape: f32[2,36,192], index: 0, kind: input, shape index: {}]   ;;  %s655_s1 = inlined_call_operand.vmem [shape: f32[4,36], index: 1, kind: input, shape index: {}]   ;;  %s656_s2 = inlined_call_operand.vmem [shape: f32[4,1], index: 2, kind: input, shape index: {}]   ;;  %s657_s3 = inlined_call_operand.hbm [shape: f32[2,4,192], index: 3, kind: output, shape index: {}]  }
   0x1   :  { %10 = vsyncpa [#allocation3 + $0x1], 0  ;;  %s547_s12 = smov 0   ;;  %s549_s13 = smov 0  }
   0x2   :  { %s551_s14 = smov 0   ;;  %s553_s15 = smov 0  }
   0x3   :  { %s555_s16 = smov 0   ;;  %s557_s17 = smov 0  }
   0x4 LB: > { %s371_s18 = sadd.s32 4294967295, %s524_s17   ;;  %s372_s19 = sadd.s32 4294967294, %s524_s17   ;;  %s524_s17 = sphi %s557_s17, %s16_s17   ;;  %s520_s16 = sphi %s555_s16, %s664_s16   ;;  %s516_s15 = sphi %s553_s15, %s663_s15   ;;  %s512_s14 = sphi %s551_s14, %s662_s14   ;;  %s508_s13 = sphi %s549_s13, %s661_s13   ;;  %s504_s12 = sphi %s547_s12, %s660_s12  }
   0x5   : > { %s28_s20 = sadd.s32 1, %s520_s16  ;;  %s107_s21 = sadd.s32 1, %s512_s14 }
   0x6   : > { %p30_p0 = scmp.ge.s32.totalorder %s28_s20, 2  ;;  %p117_p1 = scmp.ne.s32.totalorder %s512_s14, %s508_s13 }
   0x7   : > { %p118_p2 = scmp.eq.s32.totalorder %s371_s18, 1  ;;  %p123_p3 = scmp.ne.s32.totalorder %s508_s13, %s504_s12 }
   0x8   : > { %s666_s20 = smov (%p30_p0, %s28_s20), 0  ;;  %p124_p5 = scmp.eq.s32.totalorder %s372_s19, 1 }
   0x9   : > { %p587_p4 = por %p118_p2, %p117_p1  ;;  %s102_s23 = ssub.s32 %s520_s16, %s666_s20 }
   0xa   : > { %p375_p6 = scmp.ge.s32.totalorder %s524_s17, 1  ;;  %p105_p7 = scmp.eq.s32.totalorder %s102_s23, 0 }
   0xb   : > { %p594_p8 = por %p124_p5, %p123_p3  ;;  %p161_p9 = scmp.lt.s32.totalorder %s524_s17, 3 }
   0xc   : > { %s600_s25 = scalar_select %p105_p7, %s512_s14, %s107_s21  }
   0xd   : > { %p162_p10 = pnand %p375_p6, %p161_p9 }
   0xe   : > { %p190_p11 = scmp.lt.s32.totalorder (!%p162_p10), %s516_s15, 1  ;;  %s186_s8 = sand.u32 (!%p162_p10), 1, %s508_s13  }
   0xf   : > { %165 = sbr.rel (%p162_p10) target bundleno = 169 (0xa9), region = 32  ;;  %s376_s9 = sshll.u32 (!%p162_p10), %s186_s8, 3 }
  0x10   : > { %s387_s10 = sshll.u32 (!%p162_p10), %s516_s15, 3  ;;  %s188_s21 = scalar_lea.vmem (!%p162_p10), [#allocation2], %s376_s9 }
  0x11   : > { %s290_s19 = scalar_lea.hbm (!%p162_p10), %s657_s3, %s387_s10  ;;  %s292_s23 = sshll.u32 (!%p162_p10), %s188_s21, 4  ;;  %s293_s23 = int_to_ptr.vmem [resolvable:$true] %s292_s23 }
  0x12   : > { %s294_s26 = sshll.u32 (!%p162_p10), %s290_s19, 4  ;;  %s466_s4 = scalar_lea.hbm (!%p162_p10), %s657_s3, 16  ;;  %s295_s26 = int_to_ptr.hbm [resolvable:$true] %s294_s26 }
  0x13   : > { %s460_s27 = sshra.s32 (!%p162_p10), %s295_s26, 4  ;;  %s461_s27 = int_to_ptr.hbm [resolvable:$true] %s460_s27 }
  0x14   : > { %v526_v0 = vmov 0   ;;  %v211_v1 = vld [vmem:[%s656_s2] sm:$0xf]  ;;  %s191_s28 = scalar_select %p190_p11, %s516_s15, 1  ;;  %vm221_vm0 = vcmask 1043456   ;;  %vm217_vm1 = vcmask 293888  }
  0x15   : > { %445 = vset.pattern.permute.xlu0 %v526_v0  ;;  %v200_v12 = vld [vmem:[%s655_s1] sm:$0xf]  ;;  %vm273_vm2 = vcmask 523268   ;;  %s277_s15 = scalar_lea.sflag [#allocation3], %s186_s8  ;;  %p467_p1 = scmp.lt.s32.totalorder %s461_s27, %s657_s3 }
  0x16   : > { %214 = vperm.xlu0 %445, %v211_v1   ;;  %s388_s29 = smul.u32 80, %s191_s28  ;;  %vm274_vm3 = vmor %vm273_vm2, %vm221_vm0  ;;  %s462_s28 = scalar_lea.hbm %s461_s27, 8 }
  0x17   : > { %p463_p12 = scmp.ne.s32.totalorder %s461_s27, %s462_s28  ;;  %p468_p2 = scmp.lt.s32.totalorder %s466_s4, %s462_s28 }
  0x18   : > { %s197_s5 = scalar_lea.vmem %s654_s0, %s388_s29 }
  0x19   : > { %v209_v2 = vld [vmem:[%s197_s5 + $0x40] sm:$0xf]  ;;  %v210_v3 = vld [vmem:[%s197_s5 + $0x48] sm:$0xf]  ;;  %v207_v4 = vld [vmem:[%s197_s5 + $0x30] sm:$0xff]  ;;  %p464_p13 = pnand %p463_p12, %p587_p4  ;;  %p469_p3 = por %p468_p2, %p467_p1 }
  0x1a   : > { %378 = vmatpush.msk.msra.mxu0 %vm221_vm0, %v209_v2  ;;  %380 = vmatpush.msk.msra.mxu1 %vm221_vm0, %v210_v3  ;;  %v208_v5 = vld [vmem:[%s197_s5 + $0x38] sm:$0xff]  ;;  %v205_v6 = vld [vmem:[%s197_s5 + $0x20] sm:$0xff]  ;;  %v206_v7 = vld [vmem:[%s197_s5 + $0x28] sm:$0xff] }
  0x1b   : > { %v203_v8 = vld [vmem:[%s197_s5 + $0x10] sm:$0xff]  ;;  %v204_v9 = vld [vmem:[%s197_s5 + $0x18] sm:$0xff]  ;;  %v201_v10 = vld [vmem:[%s197_s5] sm:$0xff]  ;;  %p465_p0 = pneg %p464_p13 }
  0x1c   : > { %240 = vmatpush.msra.mxu0 %v207_v4  ;;  %260 = vmatpush.msra.mxu1 %v208_v5  ;;  %v202_v11 = vld [vmem:[%s197_s5 + $0x8] sm:$0xff] }
  0x1d   : > { %p470_p5 = pnand %p469_p3, %p465_p0 }
  0x1e   : > { %241 = vmatpush.msra.mxu0 %v205_v6  ;;  %261 = vmatpush.msra.mxu1 %v206_v7 }
  0x20   : > { %242 = vmatpush.msra.mxu0 %v203_v8  ;;  %262 = vmatpush.msra.mxu1 %v204_v9 }
  0x22   : > { %243 = vmatpush.msra.mxu0 %v201_v10  ;;  %263 = vmatpush.msra.mxu1 %v202_v11 }
  0x23   : > { %379 = vmatmul.msk.f32.vlgmr.msra.gmra.mxu0 %vm217_vm1, %v200_v12  ;;  %381 = vmatmul.msk.f32.vlgmr.msra.gmra.mxu1 %vm217_vm1, %v200_v12 }
  0x88   : > { %v215_v13 = vpop.permute.xlu0 %214 }
  0xa0   : > { %v245_v14 = vpop.f32.mrf.mxu0  ;;  %v265_v15 = vpop.f32.mrf.mxu1 }
  0xa1   : > { %v266_v16 = vadd.f32 %v265_v15, %v215_v13  ;;  %v246_v17 = vadd.f32 %v245_v14, %v215_v13 }
  0xa3   : > { %v270_v18 = vrot.slane %v266_v16, 4 }
  0xa5   : > { %v271_v19 = vsel %vm221_vm0, %v246_v17, %v270_v18 }
  0xa6   : > { %275 = vst.msk [vmem:[%s188_s21] sm:$0xff] %vm274_vm3, %v271_v19 }
  0xa7   : > { %473 = shalt.err (!%p470_p5)
}
  0xa8   : > { %389 = dma.vmem_to_hbm [thread:$0]  (%p587_p4), %s293_s23, 128, %s295_s26, %s277_s15  }
  0xa9 PF: > { %p395_p6 = scmp.ge.s32.totalorder %s524_s17, 2  ;;  %s306_s7 = sand.u32 1, %s504_s12  }
  0xaa   : > { %s307_s8 = scalar_lea.sflag [#allocation3], %s306_s7 }
  0xab   : > { %p392_p7 = pnand %p395_p6, %p594_p8 }
  0xad   : > { %p393_p9 = pneg %p392_p7 }
  0xaf   : > { %499 = dma.done.wait (%p393_p9), %s307_s8, 128  }
  0xb0   : > { %501 = vsyncadd (%p393_p9), %s307_s8, 4294967168  ;;  %s16_s17 = sadd.s32 1, %s524_s17   ;;  %s660_s12 = smov %s508_s13 }
  0xb1   : > { %p13_p10 = scmp.ge.s32.totalorder %s16_s17, 4   ;;  %s661_s13 = smov %s512_s14 }
  0xb2   : > { %s662_s14 = smov %s600_s25  ;;  %s663_s15 = smov %s520_s16 }
  0xb3   : > { %s664_s16 = smov %s666_s20  ;;  %15 = sbr.rel (!%p13_p10) target bundleno = 4 (0x4), region = 67 }
  0xb8   :  { %313 = vsyncpa [#allocation3], 1 }
  0xb9   :  { %315 = vsyncpa [#allocation3 + $0x1], 1 }

</bundles_post_ra>
